<compile_context>
chip_gen: v7x
topology: tpu7x:2x2x1
jax: 0.10.0
libtpu: 0.0.40
codegen_flags: <defaults>
</compile_context>

<pallas_src>
import jax
import jax.numpy as jnp
from jax.experimental import pallas as pl
from jax.experimental.pallas import tpu as pltpu


def _parallel_mlp_kernel(x_ref, w1_ref, b1_ref, w2_ref, b2_ref, o_ref):
    """One batch tile, all n replicas, compact per-replica weights.

    x_ref : [TB, n, D_in] (outer_rank==2) or [TB, D_in] (shared input, outer_rank==1)
    w1_ref: [n, D_in, H]      -- VMEM-resident across all batch tiles (constant index_map)
    b1_ref: [n, 1, H]         -- f32
    w2_ref: [n, H, D_out]
    b2_ref: [n, 1, D_out]     -- f32
    o_ref : [TB, n*D_out]     -- single lane-dense output slab per batch tile
    """
    n, _, d_out = w2_ref.shape
    shared = x_ref.ndim == 2
    x_shared = x_ref[...].astype(w1_ref.dtype) if shared else None

    # n is small and static: this unrolls into "n small MXU passes" on compact
    # per-replica weights (no O(n^2) block-diagonal materialization).
    for i in range(n):
        xi = x_shared if shared else x_ref[:, i, :].astype(w1_ref.dtype)
        h = jnp.dot(xi, w1_ref[i], preferred_element_type=jnp.float32)
        h = jnp.maximum(h + b1_ref[i].astype(jnp.float32), 0.0)      # bias + ReLU, f32 VPU
        y = jnp.dot(h.astype(w2_ref.dtype), w2_ref[i],
                    preferred_element_type=jnp.float32)
        y = y + b2_ref[i].astype(jnp.float32)
        o_ref[:, i * d_out:(i + 1) * d_out] = y.astype(o_ref.dtype)


def prepare_params(params, weights_dtype=jnp.float32):
    """One-time parameter preparation, hoisted out of the forward path.

    Weights keep the compact per-replica layout (no block-diagonal blowup).
    Optionally cast the two weight matrices to bf16 (halves weight DMA on
    v6e/v7x; MXU still accumulates in f32).  Biases stay f32.
    """
    out = dict(params)
    out["w1"] = params["w1"].astype(weights_dtype)
    out["w2"] = params["w2"].astype(weights_dtype)
    return out


def naive_parallel_forward(inputs, params, state=(), *, batch_tile=512):
    """Pallas implementation of NaiveParallelNetwork.forward.

    Args:
      inputs: [B, n, D_in] (outer_rank 2) or [B, D_in] (outer_rank 1), float32.
      params: dict with compact per-replica weights:
              w1 [n, D_in, H], b1 [n, 1, H], w2 [n, H, D_out], b2 [n, 1, D_out].
      state:  must be () (the base MLP is stateless).
      batch_tile: batch rows per grid step (>=512 approaches HBM roofline; small
              batches collapse to a single tile).
    Returns:
      (output [B, n, D_out], next_state ()).
    """
    assert state == (), "base network is stateless; state must be ()"
    w1, b1, w2, b2 = params["w1"], params["b1"], params["w2"], params["b2"]
    n, d_in, hidden = w1.shape
    d_out = w2.shape[-1]

    outer_rank = inputs.ndim - 1            # base input spec is rank-1 (D_in,)
    assert 1 <= outer_rank <= 2, "inputs should be [B, n, D_in] or [B, D_in]"
    b = inputs.shape[0]

    tb = b if b <= batch_tile else batch_tile       # tb==B (full) or 512 (8-aligned)
    grid = (pl.cdiv(b, tb),)

    if outer_rank == 2:
        assert inputs.shape[1] == n and inputs.shape[2] == d_in
        x_spec = pl.BlockSpec((tb, n, d_in), lambda j: (j, 0, 0))
    else:
        assert inputs.shape[1] == d_in
        x_spec = pl.BlockSpec((tb, d_in), lambda j: (j, 0))

    # Constant index_map: block index never changes across grid steps, so Pallas
    # DMAs the weights/biases once and keeps them VMEM-resident while the
    # activation tiles double-buffer underneath.
    def resident(shape):
        return pl.BlockSpec(shape, lambda j: (0,) * len(shape))

    out_flat = pl.pallas_call(
        _parallel_mlp_kernel,
        out_shape=jax.ShapeDtypeStruct((b, n * d_out), inputs.dtype),
        grid=grid,
        in_specs=[
            x_spec,
            resident((n, d_in, hidden)),   # w1
            resident((n, 1, hidden)),      # b1
            resident((n, hidden, d_out)),  # w2
            resident((n, 1, d_out)),       # b2
        ],
        out_specs=pl.BlockSpec((tb, n * d_out), lambda j: (j, 0)),
        compiler_params=pltpu.CompilerParams(
            # Batch tiles are independent -> shard across v7x's 2 TensorCores.
            dimension_semantics=("parallel",),
            vmem_limit_bytes=32 * 1024 * 1024),
    )(inputs, w1, b1, w2, b2)

    output = out_flat.reshape(b, n, d_out)          # contiguous (free) reshape
    return output, ()


def _reference_forward(inputs, params):
    """Pure-JAX reference: loop over replicas like the PyTorch module."""
    w1, b1, w2, b2 = params["w1"], params["b1"], params["w2"], params["b2"]
    n = w1.shape[0]
    outs = []
    for i in range(n):
        xi = inputs[:, i, :] if inputs.ndim == 3 else inputs
        h = jnp.maximum(xi @ w1[i] + b1[i], 0.0)
        outs.append(h @ w2[i] + b2[i])
    return jnp.stack(outs, axis=1)


def make_params(key, n, d_in, hidden, d_out):
    """Deterministic, independently initialized weights for the n replicas."""
    k1, k2, k3, k4 = jax.random.split(key, 4)
    scale1 = 1.0 / jnp.sqrt(d_in)
    scale2 = 1.0 / jnp.sqrt(hidden)
    return {
        "w1": jax.random.uniform(k1, (n, d_in, hidden), jnp.float32,
                                 -scale1, scale1),
        "b1": jax.random.uniform(k2, (n, 1, hidden), jnp.float32,
                                 -scale1, scale1),
        "w2": jax.random.uniform(k3, (n, hidden, d_out), jnp.float32,
                                 -scale2, scale2),
        "b2": jax.random.uniform(k4, (n, 1, d_out), jnp.float32,
                                 -scale2, scale2),
    }


if __name__ == "__main__":
    B, N, D_IN, HIDDEN, D_OUT = 2, 4, 16, 32, 8

    key = jax.random.PRNGKey(0)
    k_params, k_x = jax.random.split(key)
    params = make_params(k_params, N, D_IN, HIDDEN, D_OUT)
    prepped = prepare_params(params)                 # f32 weights: exact parity path

    # outer_rank == 2 case: per-replica inputs [B, n, D_in]
    x2 = jax.random.normal(k_x, (B, N, D_IN), jnp.float32)
    out2, state2 = naive_parallel_forward(x2, prepped)
    out2 = jax.block_until_ready(out2)
    ref2 = _reference_forward(x2, params)
    assert out2.shape == (B, N, D_OUT)
    assert state2 == ()
    assert jnp.allclose(out2, ref2, atol=1e-5, rtol=1e-5)

    # outer_rank == 1 case: shared inputs [B, D_in]
    x1 = x2[:, 0, :]
    out1, _ = naive_parallel_forward(x1, prepped)
    out1 = jax.block_until_ready(out1)
    ref1 = _reference_forward(x1, params)
    assert out1.shape == (B, N, D_OUT)
    assert jnp.allclose(out1, ref1, atol=1e-5, rtol=1e-5)

    # bf16 weight-storage path (halved weight DMA on v6e/v7x; f32 accumulation).
    prepped_bf16 = prepare_params(params, jnp.bfloat16)
    out_bf16, _ = naive_parallel_forward(x2, prepped_bf16)
    out_bf16 = jax.block_until_ready(out_bf16)
    assert out_bf16.shape == (B, N, D_OUT)
    assert jnp.allclose(out_bf16, ref2, atol=2e-2, rtol=2e-2)

    # TODO(synk): distribution-valued outputs / recurrent state nests from the generic
    # ALF Network API are not modeled; the base net here is a stateless MLP.  For very
    # large n (hundreds+), add a second grid axis over replica groups so per-step weight
    # blocks stay small and both grid axes remain "parallel" for v7x.
    print("KERNEL_OK")
</pallas_src>

<mosaic_0001>
module attributes {stable_mosaic.version = 11 : i64} {
  func.func @_parallel_mlp_kernel(%arg0: i32, %arg1: memref<2x4x16xf32, #tpu.memory_space<vmem>>, %arg2: memref<4x16x32xf32, #tpu.memory_space<vmem>>, %arg3: memref<4x1x32xf32, #tpu.memory_space<vmem>>, %arg4: memref<4x32x8xf32, #tpu.memory_space<vmem>>, %arg5: memref<4x1x8xf32, #tpu.memory_space<vmem>>, %arg6: memref<2x32xf32, #tpu.memory_space<vmem>>) attributes {dimension_semantics = [#tpu.dimension_semantics<parallel>], iteration_bounds = array<i64: 1>, scalar_prefetch = 0 : i64, scratch_operands = 0 : i64, tpu.core_type = #tpu.core_type<tc>, window_params = [{transform_indices = @transform_0, window_bounds = array<i64: 2, 4, 16>}, {pipeline_mode = #tpu.pipeline_mode<synchronous>, transform_indices = @transform_1, window_bounds = array<i64: 4, 16, 32>}, {pipeline_mode = #tpu.pipeline_mode<synchronous>, transform_indices = @transform_2, window_bounds = array<i64: 4, 1, 32>}, {pipeline_mode = #tpu.pipeline_mode<synchronous>, transform_indices = @transform_3, window_bounds = array<i64: 4, 32, 8>}, {pipeline_mode = #tpu.pipeline_mode<synchronous>, transform_indices = @transform_4, window_bounds = array<i64: 4, 1, 8>}, {transform_indices = @transform_5, window_bounds = array<i64: 2, 32>}]} {
    %c0 = arith.constant 0 : index
    %c0_0 = arith.constant 0 : index
    %c0_1 = arith.constant 0 : index
    %0 = vector.load %arg1[%c0, %c0_0, %c0_1] : memref<2x4x16xf32, #tpu.memory_space<vmem>>, vector<2x1x16xf32>
    %1 = vector.shape_cast %0 : vector<2x1x16xf32> to vector<2x16xf32>
    %c0_2 = arith.constant 0 : index
    %c0_3 = arith.constant 0 : index
    %c0_4 = arith.constant 0 : index
    %2 = vector.load %arg2[%c0_2, %c0_3, %c0_4] : memref<4x16x32xf32, #tpu.memory_space<vmem>>, vector<1x16x32xf32>
    %3 = vector.shape_cast %2 : vector<1x16x32xf32> to vector<16x32xf32>
    %cst = arith.constant dense<0.000000e+00> : vector<2x32xf32>
    %4 = tpu.matmul %1, %3, %cst {dimension_numbers = #tpu.dot_dimension_numbers<[1], [0], [0], [1], [0, 0, 1, 1], [], []>} : vector<2x16xf32>, vector<16x32xf32>, vector<2x32xf32> -> vector<2x32xf32>
    %c0_5 = arith.constant 0 : index
    %c0_6 = arith.constant 0 : index
    %c0_7 = arith.constant 0 : index
    %5 = vector.load %arg3[%c0_5, %c0_6, %c0_7] : memref<4x1x32xf32, #tpu.memory_space<vmem>>, vector<1x1x32xf32>
    %6 = vector.shape_cast %5 : vector<1x1x32xf32> to vector<1x32xf32>
    %7 = vector.broadcast %6 : vector<1x32xf32> to vector<2x32xf32>
    %8 = arith.addf %4, %7 : vector<2x32xf32>
    %cst_8 = arith.constant 0.000000e+00 : f32
    %9 = vector.broadcast %cst_8 : f32 to vector<2x32xf32>
    %10 = arith.maximumf %8, %9 : vector<2x32xf32>
    %c0_9 = arith.constant 0 : index
    %c0_10 = arith.constant 0 : index
    %c0_11 = arith.constant 0 : index
    %11 = vector.load %arg4[%c0_9, %c0_10, %c0_11] : memref<4x32x8xf32, #tpu.memory_space<vmem>>, vector<1x32x8xf32>
    %12 = vector.shape_cast %11 : vector<1x32x8xf32> to vector<32x8xf32>
    %cst_12 = arith.constant dense<0.000000e+00> : vector<2x8xf32>
    %13 = tpu.matmul %10, %12, %cst_12 {dimension_numbers = #tpu.dot_dimension_numbers<[1], [0], [0], [1], [0, 0, 1, 1], [], []>} : vector<2x32xf32>, vector<32x8xf32>, vector<2x8xf32> -> vector<2x8xf32>
    %c0_13 = arith.constant 0 : index
    %c0_14 = arith.constant 0 : index
    %c0_15 = arith.constant 0 : index
    %14 = vector.load %arg5[%c0_13, %c0_14, %c0_15] : memref<4x1x8xf32, #tpu.memory_space<vmem>>, vector<1x1x8xf32>
    %15 = vector.shape_cast %14 : vector<1x1x8xf32> to vector<1x8xf32>
    %16 = vector.broadcast %15 : vector<1x8xf32> to vector<2x8xf32>
    %17 = arith.addf %13, %16 : vector<2x8xf32>
    %c0_16 = arith.constant 0 : index
    %c0_17 = arith.constant 0 : index
    %18 = vector.load %arg6[%c0_16, %c0_17] : memref<2x32xf32, #tpu.memory_space<vmem>>, vector<2x8xf32>
    tpu.vector_store %arg6[%c0_16, %c0_17], %17 {strides = array<i32>} : memref<2x32xf32, #tpu.memory_space<vmem>>, vector<2x8xf32>,
    %c0_18 = arith.constant 0 : index
    %c1 = arith.constant 1 : index
    %c0_19 = arith.constant 0 : index
    %19 = vector.load %arg1[%c0_18, %c1, %c0_19] : memref<2x4x16xf32, #tpu.memory_space<vmem>>, vector<2x1x16xf32>
    %20 = vector.shape_cast %19 : vector<2x1x16xf32> to vector<2x16xf32>
    %c1_20 = arith.constant 1 : index
    %c0_21 = arith.constant 0 : index
    %c0_22 = arith.constant 0 : index
    %21 = vector.load %arg2[%c1_20, %c0_21, %c0_22] : memref<4x16x32xf32, #tpu.memory_space<vmem>>, vector<1x16x32xf32>
    %22 = vector.shape_cast %21 : vector<1x16x32xf32> to vector<16x32xf32>
    %cst_23 = arith.constant dense<0.000000e+00> : vector<2x32xf32>
    %23 = tpu.matmul %20, %22, %cst_23 {dimension_numbers = #tpu.dot_dimension_numbers<[1], [0], [0], [1], [0, 0, 1, 1], [], []>} : vector<2x16xf32>, vector<16x32xf32>, vector<2x32xf32> -> vector<2x32xf32>
    %c1_24 = arith.constant 1 : index
    %c0_25 = arith.constant 0 : index
    %c0_26 = arith.constant 0 : index
    %24 = vector.load %arg3[%c1_24, %c0_25, %c0_26] : memref<4x1x32xf32, #tpu.memory_space<vmem>>, vector<1x1x32xf32>
    %25 = vector.shape_cast %24 : vector<1x1x32xf32> to vector<1x32xf32>
    %26 = vector.broadcast %25 : vector<1x32xf32> to vector<2x32xf32>
    %27 = arith.addf %23, %26 : vector<2x32xf32>
    %cst_27 = arith.constant 0.000000e+00 : f32
    %28 = vector.broadcast %cst_27 : f32 to vector<2x32xf32>
    %29 = arith.maximumf %27, %28 : vector<2x32xf32>
    %c1_28 = arith.constant 1 : index
    %c0_29 = arith.constant 0 : index
    %c0_30 = arith.constant 0 : index
    %30 = vector.load %arg4[%c1_28, %c0_29, %c0_30] : memref<4x32x8xf32, #tpu.memory_space<vmem>>, vector<1x32x8xf32>
    %31 = vector.shape_cast %30 : vector<1x32x8xf32> to vector<32x8xf32>
    %cst_31 = arith.constant dense<0.000000e+00> : vector<2x8xf32>
    %32 = tpu.matmul %29, %31, %cst_31 {dimension_numbers = #tpu.dot_dimension_numbers<[1], [0], [0], [1], [0, 0, 1, 1], [], []>} : vector<2x32xf32>, vector<32x8xf32>, vector<2x8xf32> -> vector<2x8xf32>
    %c1_32 = arith.constant 1 : index
    %c0_33 = arith.constant 0 : index
    %c0_34 = arith.constant 0 : index
    %33 = vector.load %arg5[%c1_32, %c0_33, %c0_34] : memref<4x1x8xf32, #tpu.memory_space<vmem>>, vector<1x1x8xf32>
    %34 = vector.shape_cast %33 : vector<1x1x8xf32> to vector<1x8xf32>
    %35 = vector.broadcast %34 : vector<1x8xf32> to vector<2x8xf32>
    %36 = arith.addf %32, %35 : vector<2x8xf32>
    %c0_35 = arith.constant 0 : index
    %c8 = arith.constant 8 : index
    %37 = vector.load %arg6[%c0_35, %c8] : memref<2x32xf32, #tpu.memory_space<vmem>>, vector<2x8xf32>
    tpu.vector_store %arg6[%c0_35, %c8], %36 {strides = array<i32>} : memref<2x32xf32, #tpu.memory_space<vmem>>, vector<2x8xf32>,
    %c0_36 = arith.constant 0 : index
    %c2 = arith.constant 2 : index
    %c0_37 = arith.constant 0 : index
    %38 = vector.load %arg1[%c0_36, %c2, %c0_37] : memref<2x4x16xf32, #tpu.memory_space<vmem>>, vector<2x1x16xf32>
    %39 = vector.shape_cast %38 : vector<2x1x16xf32> to vector<2x16xf32>
    %c2_38 = arith.constant 2 : index
    %c0_39 = arith.constant 0 : index
    %c0_40 = arith.constant 0 : index
    %40 = vector.load %arg2[%c2_38, %c0_39, %c0_40] : memref<4x16x32xf32, #tpu.memory_space<vmem>>, vector<1x16x32xf32>
    %41 = vector.shape_cast %40 : vector<1x16x32xf32> to vector<16x32xf32>
    %cst_41 = arith.constant dense<0.000000e+00> : vector<2x32xf32>
    %42 = tpu.matmul %39, %41, %cst_41 {dimension_numbers = #tpu.dot_dimension_numbers<[1], [0], [0], [1], [0, 0, 1, 1], [], []>} : vector<2x16xf32>, vector<16x32xf32>, vector<2x32xf32> -> vector<2x32xf32>
    %c2_42 = arith.constant 2 : index
    %c0_43 = arith.constant 0 : index
    %c0_44 = arith.constant 0 : index
    %43 = vector.load %arg3[%c2_42, %c0_43, %c0_44] : memref<4x1x32xf32, #tpu.memory_space<vmem>>, vector<1x1x32xf32>
    %44 = vector.shape_cast %43 : vector<1x1x32xf32> to vector<1x32xf32>
    %45 = vector.broadcast %44 : vector<1x32xf32> to vector<2x32xf32>
    %46 = arith.addf %42, %45 : vector<2x32xf32>
    %cst_45 = arith.constant 0.000000e+00 : f32
    %47 = vector.broadcast %cst_45 : f32 to vector<2x32xf32>
    %48 = arith.maximumf %46, %47 : vector<2x32xf32>
    %c2_46 = arith.constant 2 : index
    %c0_47 = arith.constant 0 : index
    %c0_48 = arith.constant 0 : index
    %49 = vector.load %arg4[%c2_46, %c0_47, %c0_48] : memref<4x32x8xf32, #tpu.memory_space<vmem>>, vector<1x32x8xf32>
    %50 = vector.shape_cast %49 : vector<1x32x8xf32> to vector<32x8xf32>
    %cst_49 = arith.constant dense<0.000000e+00> : vector<2x8xf32>
    %51 = tpu.matmul %48, %50, %cst_49 {dimension_numbers = #tpu.dot_dimension_numbers<[1], [0], [0], [1], [0, 0, 1, 1], [], []>} : vector<2x32xf32>, vector<32x8xf32>, vector<2x8xf32> -> vector<2x8xf32>
    %c2_50 = arith.constant 2 : index
    %c0_51 = arith.constant 0 : index
    %c0_52 = arith.constant 0 : index
    %52 = vector.load %arg5[%c2_50, %c0_51, %c0_52] : memref<4x1x8xf32, #tpu.memory_space<vmem>>, vector<1x1x8xf32>
    %53 = vector.shape_cast %52 : vector<1x1x8xf32> to vector<1x8xf32>
    %54 = vector.broadcast %53 : vector<1x8xf32> to vector<2x8xf32>
    %55 = arith.addf %51, %54 : vector<2x8xf32>
    %c0_53 = arith.constant 0 : index
    %c16 = arith.constant 16 : index
    %56 = vector.load %arg6[%c0_53, %c16] : memref<2x32xf32, #tpu.memory_space<vmem>>, vector<2x8xf32>
    tpu.vector_store %arg6[%c0_53, %c16], %55 {strides = array<i32>} : memref<2x32xf32, #tpu.memory_space<vmem>>, vector<2x8xf32>,
    %c0_54 = arith.constant 0 : index
    %c3 = arith.constant 3 : index
    %c0_55 = arith.constant 0 : index
    %57 = vector.load %arg1[%c0_54, %c3, %c0_55] : memref<2x4x16xf32, #tpu.memory_space<vmem>>, vector<2x1x16xf32>
    %58 = vector.shape_cast %57 : vector<2x1x16xf32> to vector<2x16xf32>
    %c3_56 = arith.constant 3 : index
    %c0_57 = arith.constant 0 : index
    %c0_58 = arith.constant 0 : index
    %59 = vector.load %arg2[%c3_56, %c0_57, %c0_58] : memref<4x16x32xf32, #tpu.memory_space<vmem>>, vector<1x16x32xf32>
    %60 = vector.shape_cast %59 : vector<1x16x32xf32> to vector<16x32xf32>
    %cst_59 = arith.constant dense<0.000000e+00> : vector<2x32xf32>
    %61 = tpu.matmul %58, %60, %cst_59 {dimension_numbers = #tpu.dot_dimension_numbers<[1], [0], [0], [1], [0, 0, 1, 1], [], []>} : vector<2x16xf32>, vector<16x32xf32>, vector<2x32xf32> -> vector<2x32xf32>
    %c3_60 = arith.constant 3 : index
    %c0_61 = arith.constant 0 : index
    %c0_62 = arith.constant 0 : index
    %62 = vector.load %arg3[%c3_60, %c0_61, %c0_62] : memref<4x1x32xf32, #tpu.memory_space<vmem>>, vector<1x1x32xf32>
    %63 = vector.shape_cast %62 : vector<1x1x32xf32> to vector<1x32xf32>
    %64 = vector.broadcast %63 : vector<1x32xf32> to vector<2x32xf32>
    %65 = arith.addf %61, %64 : vector<2x32xf32>
    %cst_63 = arith.constant 0.000000e+00 : f32
    %66 = vector.broadcast %cst_63 : f32 to vector<2x32xf32>
    %67 = arith.maximumf %65, %66 : vector<2x32xf32>
    %c3_64 = arith.constant 3 : index
    %c0_65 = arith.constant 0 : index
    %c0_66 = arith.constant 0 : index
    %68 = vector.load %arg4[%c3_64, %c0_65, %c0_66] : memref<4x32x8xf32, #tpu.memory_space<vmem>>, vector<1x32x8xf32>
    %69 = vector.shape_cast %68 : vector<1x32x8xf32> to vector<32x8xf32>
    %cst_67 = arith.constant dense<0.000000e+00> : vector<2x8xf32>
    %70 = tpu.matmul %67, %69, %cst_67 {dimension_numbers = #tpu.dot_dimension_numbers<[1], [0], [0], [1], [0, 0, 1, 1], [], []>} : vector<2x32xf32>, vector<32x8xf32>, vector<2x8xf32> -> vector<2x8xf32>
    %c3_68 = arith.constant 3 : index
    %c0_69 = arith.constant 0 : index
    %c0_70 = arith.constant 0 : index
    %71 = vector.load %arg5[%c3_68, %c0_69, %c0_70] : memref<4x1x8xf32, #tpu.memory_space<vmem>>, vector<1x1x8xf32>
    %72 = vector.shape_cast %71 : vector<1x1x8xf32> to vector<1x8xf32>
    %73 = vector.broadcast %72 : vector<1x8xf32> to vector<2x8xf32>
    %74 = arith.addf %70, %73 : vector<2x8xf32>
    %c0_71 = arith.constant 0 : index
    %c24 = arith.constant 24 : index
    %75 = vector.load %arg6[%c0_71, %c24] : memref<2x32xf32, #tpu.memory_space<vmem>>, vector<2x8xf32>
    tpu.vector_store %arg6[%c0_71, %c24], %74 {strides = array<i32>} : memref<2x32xf32, #tpu.memory_space<vmem>>, vector<2x8xf32>,
    return
  }
  func.func @transform_0(%arg0: i32) -> (i32, i32, i32) {
    %c0_i32 = arith.constant 0 : i32
    %c0_i32_0 = arith.constant 0 : i32
    %c0_i32_1 = arith.constant 0 : i32
    return %arg0, %c0_i32, %c0_i32_0 : i32, i32, i32
  }
  func.func @transform_1(%arg0: i32) -> (i32, i32, i32) {
    %c0_i32 = arith.constant 0 : i32
    %c0_i32_0 = arith.constant 0 : i32
    %c0_i32_1 = arith.constant 0 : i32
    %c0_i32_2 = arith.constant 0 : i32
    return %c0_i32, %c0_i32_0, %c0_i32_1 : i32, i32, i32
  }
  func.func @transform_2(%arg0: i32) -> (i32, i32, i32) {
    %c0_i32 = arith.constant 0 : i32
    %c0_i32_0 = arith.constant 0 : i32
    %c0_i32_1 = arith.constant 0 : i32
    %c0_i32_2 = arith.constant 0 : i32
    return %c0_i32, %c0_i32_0, %c0_i32_1 : i32, i32, i32
  }
  func.func @transform_3(%arg0: i32) -> (i32, i32, i32) {
    %c0_i32 = arith.constant 0 : i32
    %c0_i32_0 = arith.constant 0 : i32
    %c0_i32_1 = arith.constant 0 : i32
    %c0_i32_2 = arith.constant 0 : i32
    return %c0_i32, %c0_i32_0, %c0_i32_1 : i32, i32, i32
  }
  func.func @transform_4(%arg0: i32) -> (i32, i32, i32) {
    %c0_i32 = arith.constant 0 : i32
    %c0_i32_0 = arith.constant 0 : i32
    %c0_i32_1 = arith.constant 0 : i32
    %c0_i32_2 = arith.constant 0 : i32
    return %c0_i32, %c0_i32_0, %c0_i32_1 : i32, i32, i32
  }
  func.func @transform_5(%arg0: i32) -> (i32, i32) {
    %c0_i32 = arith.constant 0 : i32
    %c0_i32_0 = arith.constant 0 : i32
    return %arg0, %c0_i32 : i32, i32
  }
}

</mosaic_0001>

<bundles_post_ra>
// kernel: tpu_custom_call.1
= control target key start
LH: loop header
LB: loop body
LE: loop exit
PB: predicated region body
PF: predicated region fallthrough
CT: control target
= control target key end

     0   :  { %v969_v3 = vmov 0.0|0.0   ;;  %vm35_vm0 = vcmask 1041409   ;;  %vm970_vm1 = vmmov 0   ;;  %v971_v9 = vmov 0.0   ;;  %s1178_s0 = inlined_call_operand.vmem [shape: f32[2,4,16], index: 0, kind: input, shape index: {}]   ;;  %s1179_s1 = inlined_call_operand.vmem [shape: f32[4,16,32], index: 1, kind: input, shape index: {}]   ;;  %s1180_s2 = inlined_call_operand.vmem [shape: f32[4,1,32], index: 2, kind: input, shape index: {}]   ;;  %s1181_s3 = inlined_call_operand.vmem [shape: f32[4,32,8], index: 3, kind: input, shape index: {}]   ;;  %s1182_s4 = inlined_call_operand.vmem [shape: f32[4,1,8], index: 4, kind: input, shape index: {}]   ;;  %s1183_s5 = inlined_call_operand.hbm [shape: f32[2,32], index: 5, kind: output, shape index: {}]  }
   0x1   :  { %v23_v0 = vld [vmem:[%s1179_s1] sm:$0xff]  ;;  %v24_v1 = vld [vmem:[%s1179_s1 + $0x8] sm:$0xff]  ;;  %v762_v2 = vld [vmem:[%s1179_s1 + $0x10] sm:$0xff]  ;;  %902 = vmatprep.subr.bf16.mxu1 %v969_v3  ;;  %911 = vmatprep.subr.bf16.mxu0 %v969_v3  ;;  %vm37_vm2 = vcmask 130048  }
   0x2   :  { %v903_v4 = vpack.c.bf16 %v24_v1, %v23_v0  ;;  %v763_v5 = vld [vmem:[%s1179_s1 + $0x18] sm:$0xff]  ;;  %v21_v6 = vld [vmem:[%s1178_s0] sm:$0x1]  ;;  %v22_v7 = vld [vmem:[%s1178_s0 + $0x4] sm:$0x1]  ;;  %834 = vmatprep.mubr.msk.f32.mxu1 %vm970_vm1, %v971_v9  ;;  %852 = vmatprep.mubr.msk.f32.mxu0 %vm970_vm1, %v971_v9 }
   0x3   :  { %v912_v8 = vpack.c.bf16 %v763_v5, %v762_v2  ;;  %v34_v10 = vrot.slane %v22_v7, 7  ;;  %v198_v11 = vld [vmem:[%s1178_s0 + $0x1] sm:$0x1]  ;;  %v199_v12 = vld [vmem:[%s1178_s0 + $0x5] sm:$0x1]  ;;  %v112_v15 = vld [vmem:[%s1181_s3 + $0x8] sm:$0xff] }
   0x4   :  { %904 = vmatpush3.bf16.msra.mxu1 %v903_v4  ;;  %v213_v13 = vrot.slane %v199_v12, 7  ;;  %v111_v14 = vld [vmem:[%s1181_s3] sm:$0xff]  ;;  %v768_v19 = vld [vmem:[%s1181_s3 + $0x28] sm:$0xff] }
   0x5   :  { %v767_v16 = vld [vmem:[%s1181_s3 + $0x20] sm:$0xff]  ;;  %913 = vmatpush3.bf16.msra.mxu0 %v912_v8  ;;  %v36_v17 = vsel %vm35_vm0, %v34_v10, %v21_v6  ;;  %905 = vmatprep.subr.bf16.mxu1 %v969_v3  ;;  %v906_v18 = vpack.c.bf16 %v112_v15, %v111_v14 }
   0x6   :  { %10 = vsyncpa [#allocation3], 0  ;;  %v214_v20 = vsel %vm35_vm0, %v213_v13, %v198_v11  ;;  %914 = vmatprep.subr.bf16.mxu0 %v969_v3  ;;  %v915_v21 = vpack.c.bf16 %v768_v19, %v767_v16  ;;  %v113_v22 = vld [vmem:[%s1181_s3 + $0x10] sm:$0xff]  ;;  %v114_v23 = vld [vmem:[%s1181_s3 + $0x18] sm:$0xff]  ;;  %vm122_vm3 = vcmask 261120   ;;  %vm196_vm4 = vcmask 58368  }
   0x7   :  { %835 = vmatmul.mubr.msk.f32.vlgmr.msra.gmra.mrb[0].mxu1 %vm37_vm2, %v36_v17  ;;  %v769_v24 = vld [vmem:[%s1181_s3 + $0x30] sm:$0xff]  ;;  %v909_v25 = vpack.c.bf16 %v114_v23, %v113_v22  ;;  %v770_v26 = vld [vmem:[%s1181_s3 + $0x38] sm:$0xff]  ;;  %v758_v28 = vld [vmem:[%s1180_s2] ss:$0 sm:$0xff]  ;;  %s972_s16 = smov 8   ;;  %vm378_vm5 = vcmask 123968  }
   0x8   :  { %853 = vmatmul.mubr.msk.f32.vlgmr.msra.gmra.mrb[0].mxu0 %vm37_vm2, %v214_v20  ;;  %907 = vmatpush3.bf16.msra.mxu1 %v906_v18  ;;  %v918_v27 = vpack.c.bf16 %v770_v26, %v769_v24  ;;  %v765_v29 = vld [vmem:[%s1180_s2 + $0x1] ss:$0 sm:$0xff]  ;;  %v775_v31 = vld [vmem:[%s1179_s1 + $0x28] sm:$0xff]  ;;  %v381_v32 = vld [vmem:[%s1178_s0 + $0x6] sm:$0x1]  ;;  %s974_s19 = smov 24  }
   0x9   :  { %916 = vmatpush3.bf16.msra.mxu0 %v915_v21  ;;  %908 = vmatprep.subr.bf16.mxu1 %v969_v3  ;;  %v774_v30 = vld [vmem:[%s1179_s1 + $0x20] sm:$0xff]  ;;  %v786_v34 = vld [vmem:[%s1179_s1 + $0x30] sm:$0xff]  ;;  %v787_v35 = vld [vmem:[%s1179_s1 + $0x38] sm:$0xff]  ;;  %v395_v43 = vrot.slane %v381_v32, 7  ;;  %s975_s20 = smov [#allocation2]   ;;  %vm560_vm6 = vcmask 189568  }
   0xa   :  { %917 = vmatprep.subr.bf16.mxu0 %v969_v3  ;;  %845 = vmatprep.mubr.msk.f32.mxu1 %vm970_vm1, %v971_v9  ;;  %v563_v36 = vld [vmem:[%s1178_s0 + $0x7] sm:$0x1]  ;;  %v921_v42 = vpack.c.bf16 %v775_v31, %v774_v30  ;;  %v930_v45 = vpack.c.bf16 %v787_v35, %v786_v34  ;;  %v380_v46 = vld [vmem:[%s1178_s0 + $0x2] sm:$0x1]  ;;  %v562_v49 = vld [vmem:[%s1178_s0 + $0x3] sm:$0x1] }
   0xb   :  { %863 = vmatprep.mubr.msk.f32.mxu0 %vm970_vm1, %v971_v9  ;;  %v577_v47 = vrot.slane %v563_v36, 7  ;;  %v396_v50 = vsel %vm35_vm0, %v395_v43, %v380_v46  ;;  %v779_v52 = vld [vmem:[%s1181_s3 + $0x40] sm:$0xff]  ;;  %v780_v53 = vld [vmem:[%s1181_s3 + $0x48] sm:$0xff]  ;;  %v781_v58 = vld [vmem:[%s1181_s3 + $0x50] sm:$0xff]  ;;  %s973_s0 = smov 16   ;;  %s750_s21 = sshll.u32 %s975_s20, 4  ;;  %s751_s21 = int_to_ptr.vmem [resolvable:$true] %s750_s21 }
   0xc   :  { %910 = vmatpush3.bf16.msra.mxu1 %v909_v25  ;;  %v791_v54 = vld [vmem:[%s1181_s3 + $0x60] sm:$0xff]  ;;  %v924_v55 = vpack.c.bf16 %v780_v53, %v779_v52  ;;  %v792_v56 = vld [vmem:[%s1181_s3 + $0x68] sm:$0xff]  ;;  %v782_v59 = vld [vmem:[%s1181_s3 + $0x58] sm:$0xff]  ;;  %vm742_vm7 = vcmask 255168   ;;  %p950_p1 = scmp.lt.s32.totalorder %s751_s21, %s751_s21 }
   0xd   :  { %919 = vmatpush3.bf16.msra.mxu0 %v918_v27  ;;  %920 = vmatprep.subr.bf16.mxu1 %v969_v3  ;;  %v578_v51 = vsel %vm35_vm0, %v577_v47, %v562_v49  ;;  %v933_v57 = vpack.c.bf16 %v792_v56, %v791_v54  ;;  %v927_v60 = vpack.c.bf16 %v782_v59, %v781_v58  ;;  %v793_v61 = vld [vmem:[%s1181_s3 + $0x70] sm:$0xff]  ;;  %v794_v62 = vld [vmem:[%s1181_s3 + $0x78] sm:$0xff]  ;;  %v760_v0 = vld [vmem:[%s1182_s4] ss:$0 sm:$0xff] }
   0xe   :  { %929 = vmatprep.subr.bf16.mxu0 %v969_v3  ;;  %v936_v63 = vpack.c.bf16 %v794_v62, %v793_v61  ;;  %v772_v1 = vld [vmem:[%s1182_s4 + $0x1] ss:$0 sm:$0xff]  ;;  %v777_v8 = vld [vmem:[%s1180_s2 + $0x2] ss:$0 sm:$0xff]  ;;  %v796_v20 = vld [vmem:[%s1182_s4 + $0x3] ss:$0 sm:$0xff] }
   0xf   :  { %v784_v19 = vld [vmem:[%s1182_s4 + $0x2] ss:$0 sm:$0xff]  ;;  %s945_s4 = scalar_lea.vmem %s751_s21, 32 }
  0x10   :  { %p946_p0 = scmp.ne.s32.totalorder %s751_s21, %s945_s4  ;;  %p951_p2 = scmp.lt.s32.totalorder %s945_s4, %s945_s4 }
  0x12   :  { %p952_p3 = por %p951_p2, %p950_p1 }
  0x14   :  { %p953_p4 = pnand %p952_p3, %p946_p0 }
  0xda   :  { %v106_v33 = vpop.f32.mrb[0].mxu1 }
  0xdb   :  { %v107_v37 = vadd.f32 %v758_v28, %v106_v33  ;;  %v283_v38 = vpop.f32.mrb[0].mxu0  ;;  %v836_v39 = vpop.f32.mrb[1].mxu1 }
  0xdc   :  { %v284_v40 = vadd.f32 %v765_v29, %v283_v38  ;;  %v854_v41 = vpop.f32.mrb[1].mxu0 }
  0xdd   :  { %v110_v44 = vmax.f32 %v107_v37, 0.0 }
  0xde   :  { %v287_v48 = vmax.f32 %v284_v40, 0.0 }
  0xdf   :  { %846 = vmatmul.mubr.msk.f32.vlgmr.msra.gmra.mrb[2].mxu1 %vm122_vm3, %v110_v44 }
  0xe0   :  { %864 = vmatmul.mubr.msk.f32.vlgmr.msra.gmra.mrb[2].mxu0 %vm122_vm3, %v287_v48  ;;  %922 = vmatpush3.bf16.msra.mxu1 %v921_v42 }
  0xe1   :  { %931 = vmatpush3.bf16.msra.mxu0 %v930_v45  ;;  %870 = vmatprep.mubr.msk.f32.mxu1 %vm970_vm1, %v971_v9 }
  0xe2   :  { %888 = vmatprep.mubr.msk.f32.mxu0 %vm970_vm1, %v971_v9  ;;  %923 = vmatprep.subr.bf16.mxu1 %v969_v3 }
  0xe3   :  { %871 = vmatmul.mubr.msk.f32.vlgmr.msra.gmra.mrb[4].mxu1 %vm37_vm2, %v396_v50  ;;  %932 = vmatprep.subr.bf16.mxu0 %v969_v3 }
  0xe4   :  { %889 = vmatmul.mubr.msk.f32.vlgmr.msra.gmra.mrb[4].mxu0 %vm37_vm2, %v578_v51  ;;  %881 = vmatprep.mubr.msk.f32.mxu1 %vm970_vm1, %v971_v9 }
  0xe5   :  { %899 = vmatprep.mubr.msk.f32.mxu0 %vm970_vm1, %v971_v9  ;;  %925 = vmatpush3.bf16.msra.mxu1 %v924_v55  ;;  %v789_v9 = vld [vmem:[%s1180_s2 + $0x3] ss:$0 sm:$0xff] }
  0xe6   :  { %934 = vmatpush3.bf16.msra.mxu0 %v933_v57  ;;  %926 = vmatprep.subr.bf16.mxu1 %v969_v3 }
  0xe7   :  { %935 = vmatprep.subr.bf16.mxu0 %v969_v3 }
  0xe9   :  { %928 = vmatpush3.bf16.msra.mxu1 %v927_v60 }
  0xea   :  { %937 = vmatpush3.bf16.msra.mxu0 %v936_v63 }
 0x1b2   :  { %v192_v2 = vpop.f32.mrb[2].mxu1 }
 0x1b3   :  { %v193_v3 = vadd.f32 %v760_v0, %v192_v2  ;;  %v370_v4 = vpop.f32.mrb[2].mxu0  ;;  %v847_v5 = vpop.f32.mrb[3].mxu1 }
 0x1b4   :  { %v371_v6 = vadd.f32 %v772_v1, %v370_v4  ;;  %v865_v7 = vpop.f32.mrb[3].mxu0 }
 0x1b5   :  { %197 = vst.msk [vmem:[#allocation2] sm:$0x3] %vm196_vm4, %v193_v3 }
 0x1b6   :  { %375 = vrot.lane.b32.xlu0 %v371_v6, %s972_s16  ;;  %v465_v10 = vpop.f32.mrb[4].mxu1 }
 0x1b7   :  { %v466_v11 = vadd.f32 %v777_v8, %v465_v10  ;;  %v647_v12 = vpop.f32.mrb[4].mxu0  ;;  %v872_v13 = vpop.f32.mrb[5].mxu1 }
 0x1b8   :  { %v648_v14 = vadd.f32 %v789_v9, %v647_v12  ;;  %v890_v15 = vpop.f32.mrb[5].mxu0 }
 0x1b9   :  { %v469_v16 = vmax.f32 %v466_v11, 0.0 }
 0x1ba   :  { %v651_v17 = vmax.f32 %v648_v14, 0.0 }
 0x1bb   :  { %882 = vmatmul.mubr.msk.f32.vlgmr.msra.gmra.mrb[6].mxu1 %vm122_vm3, %v469_v16 }
 0x1bc   :  { %900 = vmatmul.mubr.msk.f32.vlgmr.msra.gmra.mrb[6].mxu0 %vm122_vm3, %v651_v17 }
 0x228   :  { %v376_v18 = vpop.permute.xlu0 %375 }
 0x229   :  { %379 = vst.msk [vmem:[#allocation2] sm:$0x3] %vm378_vm5, %v376_v18 }
 0x28e   :  { %v552_v21 = vpop.f32.mrb[6].mxu1 }
 0x28f   :  { %v553_v22 = vadd.f32 %v784_v19, %v552_v21  ;;  %v734_v23 = vpop.f32.mrb[6].mxu0  ;;  %v883_v24 = vpop.f32.mrb[7].mxu1 }
 0x290   :  { %v735_v25 = vadd.f32 %v796_v20, %v734_v23  ;;  %v901_v26 = vpop.f32.mrb[7].mxu0 }
 0x291   :  { %557 = vrot.lane.b32.xlu0 %v553_v22, %s973_s0 }
 0x292   :  { %739 = vrot.lane.b32.xlu1 %v735_v25, %s974_s19 }
 0x303   :  { %v558_v27 = vpop.permute.xlu0 %557 }
 0x304   :  { %561 = vst.msk [vmem:[#allocation2] sm:$0x3] %vm560_vm6, %v558_v27  ;;  %v740_v28 = vpop.permute.xlu1 %739 }
 0x305   :  { %743 = vst.msk [vmem:[#allocation2] sm:$0x3] %vm742_vm7, %v740_v28 }
 0x306   :  { %956 = shalt.err (!%p953_p4)
}
 0x307   :  { %s957_s24 = scalar_lea.hbm %s1183_s5, 32 }
 0x308   :  { %p958_p5 = scmp.ne.s32.totalorder %s1183_s5, %s957_s24  ;;  %p961_p6 = scmp.lt.u32.totalorder %s957_s24, %s1183_s5 }
 0x30a   :  { %p963_p7 = pnand %p961_p6, %p958_p5 }
 0x30c   :  { %966 = shalt.err (!%p963_p7)
}
 0x30d   :  { %753 = dma.vmem_to_hbm [thread:$0]  %s751_s21, 32, %s1183_s5, [#allocation3]  }
 0x30e   :  { %967 = dma.done.wait [#allocation3], 32  }
 0x30f   :  { %968 = vsyncadd [#allocation3], 4294967264 }
 0x310   :  { %757 = vsyncpa [#allocation3], 1 }

</bundles_post_ra>
